<compile_context>
chip_gen: v7x
topology: tpu7x:2x2x1
jax: 0.10.0
libtpu: 0.0.40
codegen_flags: <defaults>
</compile_context>

<pallas_src>
import jax
import jax.numpy as jnp
from jax import lax
from jax.experimental import pallas as pl
from jax.experimental.pallas import tpu as pltpu


# ---------------------------------------------------------------------------
# Hardware-aware helpers
# ---------------------------------------------------------------------------
def _physical_vmem_bytes():
    try:
        info = pltpu.get_tpu_info()
        cap = int(getattr(info, "vmem_capacity_bytes", 0))
        if cap > 0:
            return cap
    except Exception:
        pass
    return 64 << 20          # conservative (v7x-sized) fallback


def _vmem_budget():
    # ~80% of physical per-core VMEM: ~51 MiB on v7x (64 MiB phys), ~102 MiB on
    # v5e/v6e (128 MiB phys).  Never request the entire physical VMEM.
    return max(int(_physical_vmem_bytes() * 0.8), 24 << 20)


def _has_bf16_eup():
    # bf16 exp (EUP) only on v6e / v7x; v5e and older have no bf16 vector units.
    try:
        kind = jax.devices()[0].device_kind.lower()
    except Exception:
        return False
    return any(t in kind for t in ("v6", "v7", "tpu7"))


def _tile_candidates(n):
    """n itself plus every divisor of n that is a multiple of 128, descending."""
    cands = {n}
    for mult in range(n // 128, 0, -1):
        t = mult * 128
        if n % t == 0:
            cands.add(t)
    return sorted(cands, reverse=True)


# ---------------------------------------------------------------------------
# Kernel 1: GroupNorm + fused q/k/v 1x1 conv (one (C, N) block per batch element)
# ---------------------------------------------------------------------------
def _make_proj_kernel(num_groups: int, cpg: int, n_pix: int, eps: float = 1e-5):
    C = num_groups * cpg

    def kernel(x_ref, wqkv_ref, bqkv_ref, gamma_ref, beta_ref, q_ref, k_ref, v_ref):
        x = x_ref[0]                                                   # (C, N) f32

        # One-hot channel<->group maps built in-kernel (no HBM traffic for them).
        g_i = lax.broadcasted_iota(jnp.int32, (num_groups, C), 0)
        c_i = lax.broadcasted_iota(jnp.int32, (num_groups, C), 1)
        onehot_gc = ((c_i >= g_i * cpg) & (c_i < (g_i + 1) * cpg)).astype(jnp.float32)  # (G, C)
        c_j = lax.broadcasted_iota(jnp.int32, (C, num_groups), 0)
        g_j = lax.broadcasted_iota(jnp.int32, (C, num_groups), 1)
        gmap_cg = ((c_j >= g_j * cpg) & (c_j < (g_j + 1) * cpg)).astype(jnp.float32)    # (C, G)

        cnt = float(cpg * n_pix)

        # ---------- GroupNorm, single pass: sum(x) and sum(x*x) together (f32) ----------
        s1_gn = jnp.dot(onehot_gc, x, preferred_element_type=jnp.float32)        # (G, N)
        s2_gn = jnp.dot(onehot_gc, x * x, preferred_element_type=jnp.float32)    # (G, N)
        s1_g = jnp.sum(s1_gn, axis=1, keepdims=True)                             # (G, 1)
        s2_g = jnp.sum(s2_gn, axis=1, keepdims=True)                             # (G, 1)
        mean_g = s1_g / cnt
        var_g = jnp.maximum(s2_g / cnt - mean_g * mean_g, 0.0)
        scale_g = lax.rsqrt(var_g + eps)                                         # (G, 1)
        shift_g = -mean_g * scale_g                                              # (G, 1)
        # Broadcast group scalars back to per-channel rows via a tiny (C,G)@(G,N) matmul.
        scale_cn = jnp.dot(gmap_cg, jnp.broadcast_to(scale_g, (num_groups, n_pix)),
                           preferred_element_type=jnp.float32)                   # (C, N)
        shift_cn = jnp.dot(gmap_cg, jnp.broadcast_to(shift_g, (num_groups, n_pix)),
                           preferred_element_type=jnp.float32)                   # (C, N)
        hn = (x * scale_cn + shift_cn) * gamma_ref[...] + beta_ref[...]          # (C, N)

        # ---------- fused q/k/v 1x1 conv: one (3C, C) @ (C, N) MXU matmul ----------
        hb = hn.astype(jnp.bfloat16)
        qkv = jnp.dot(wqkv_ref[...], hb,
                      preferred_element_type=jnp.float32) + bqkv_ref[...]        # (3C, N) f32
        q_ref[0] = qkv[0:C].astype(jnp.bfloat16)                 # (C, N); sqrt(C) pre-folded
        # K pre-transposed once here so kernel 2's score matmul is a plain contraction.
        k_ref[0] = jnp.transpose(qkv[C:2 * C]).astype(jnp.bfloat16)              # (N, C)
        v_ref[0] = qkv[2 * C:3 * C].astype(jnp.bfloat16)         # (C, N)

    return kernel


# ---------------------------------------------------------------------------
# Kernel 2a: single-kv-tile attention + fused out conv (Tkv = N fast path)
# ---------------------------------------------------------------------------
def _make_attn_single_kernel(use_bf16_exp: bool):
    def kernel(q_ref, k_ref, v_ref, wo_ref, bo_ref, o_ref):
        q = q_ref[0]                                               # (C, Tq)  bf16 (scaled)
        k = k_ref[0]                                               # (N, C)   bf16
        v = v_ref[0]                                               # (C, N)   bf16
        # Transposed scores: s_t[m, n] = <k[m, :], q[:, n]>  ->  (N_kv, Tq)
        s_t = jnp.dot(k, q, preferred_element_type=jnp.float32)
        m = jnp.max(s_t, axis=0, keepdims=True)                    # (1, Tq)
        z = s_t - m
        p = jnp.exp(z.astype(jnp.bfloat16)) if use_bf16_exp else jnp.exp(z)
        denom = jnp.sum(p.astype(jnp.float32), axis=0, keepdims=True)            # (1, Tq)
        attn = jnp.dot(v, p.astype(jnp.bfloat16),
                       preferred_element_type=jnp.float32)                       # (C, Tq)
        attn = attn * pl.reciprocal(denom, approx=True)            # deferred normalization
        out = jnp.dot(wo_ref[...], attn.astype(jnp.bfloat16),
                      preferred_element_type=jnp.float32) + bo_ref[...]          # (C, Tq)
        o_ref[0] = out.astype(o_ref.dtype)

    return kernel


# ---------------------------------------------------------------------------
# Kernel 2b: flash-style attention + fused out conv (Tkv < N)
# grid = (B, num_q_tiles, num_kv_tiles), kv innermost ("arbitrary")
# ---------------------------------------------------------------------------
def _make_attn_flash_kernel(use_bf16_exp: bool):
    def kernel(q_ref, k_ref, v_ref, wo_ref, bo_ref, o_ref, m_sc, l_sc, acc_sc):
        ki = pl.program_id(2)

        @pl.when(ki == 0)
        def _():
            m_sc[...] = jnp.full_like(m_sc, -jnp.inf)
            l_sc[...] = jnp.zeros_like(l_sc)
            acc_sc[...] = jnp.zeros_like(acc_sc)

        q = q_ref[0]                                               # (C, Tq)   bf16
        k = k_ref[0]                                               # (Tkv, C)  bf16
        v = v_ref[0]                                               # (C, Tkv)  bf16
        s_t = jnp.dot(k, q, preferred_element_type=jnp.float32)    # (Tkv, Tq) f32

        m_prev = m_sc[...]
        m_new = jnp.maximum(m_prev, jnp.max(s_t, axis=0, keepdims=True))          # (1, Tq)
        alpha = jnp.exp(m_prev - m_new)                            # keep f32 on all gens
        z = s_t - m_new
        p = jnp.exp(z.astype(jnp.bfloat16)) if use_bf16_exp else jnp.exp(z)
        l_sc[...] = alpha * l_sc[...] + jnp.sum(p.astype(jnp.float32), axis=0, keepdims=True)
        acc_sc[...] = alpha * acc_sc[...] + jnp.dot(
            v, p.astype(jnp.bfloat16), preferred_element_type=jnp.float32)        # (C, Tq)
        m_sc[...] = m_new

        @pl.when(ki == pl.num_programs(2) - 1)
        def _():
            attn = acc_sc[...] * pl.reciprocal(l_sc[...], approx=True)
            out = jnp.dot(wo_ref[...], attn.astype(jnp.bfloat16),
                          preferred_element_type=jnp.float32) + bo_ref[...]
            o_ref[0] = out.astype(o_ref.dtype)

    return kernel


# ---------------------------------------------------------------------------
# Wrapper
# ---------------------------------------------------------------------------
def attention_block(x_nchw, params, *, max_tq=None, max_tkv=None, force_flash=False):
    """Returns (lit, attn_out), both NCHW.

    lit      -- exactly what the PyTorch forward returns: x + H (H = spatial height,
                because `h` is shadowed by `b, c, h, w = q.shape` in the reference).
    attn_out -- self.out(attention(norm(x)))  (the attention-branch output, verifiable).
    """
    B, C, H, W = x_nchw.shape
    N = H * W
    G = params["num_groups"]
    assert C % G == 0
    cpg = C // G
    scale = float(C) ** 0.5          # torch: w_ = w_ * int(c) ** 0.5 (folded into Wq/bq)

    # Channel-first (B, C, N): a free reshape of NCHW, no wrapper-side HBM transpose.
    x_bcn = x_nchw.reshape(B, C, N).astype(jnp.float32)

    # Fused q/k/v weights (y = W @ h + b in channel-first layout; W is (Cout, Cin)).
    wqkv = jnp.concatenate(
        [params["wq"] * scale, params["wk"], params["wv"]], axis=0).astype(jnp.bfloat16)   # (3C, C)
    bqkv = jnp.concatenate(
        [params["bq"] * scale, params["bk"], params["bv"]], axis=0
    ).reshape(3 * C, 1).astype(jnp.float32)
    wo = params["wo"].astype(jnp.bfloat16)                                                  # (C, C)
    bo = params["bo"].reshape(C, 1).astype(jnp.float32)
    gamma = params["gamma"].reshape(C, 1).astype(jnp.float32)
    beta = params["beta"].reshape(C, 1).astype(jnp.float32)

    budget = _vmem_budget()
    use_bf16_exp = _has_bf16_eup()

    # ------------------- kernel 1: GroupNorm + fused qkv projection -------------------
    # TODO(synk): for very large N*C on v7x (64 MiB VMEM), split into an N-tiled
    # stats pass + apply pass instead of one (C, N) block per batch element.
    k1_need = (2 * (C * N * 4 + 3 * C * N * 2 + 3 * C * C * 2)
               + 8 * C * N * 4 + (4 << 20))
    vmem1 = int(min(max(k1_need, 16 << 20), budget))

    q_bcn, k_bnc, v_bcn = pl.pallas_call(
        _make_proj_kernel(G, cpg, N),
        out_shape=(jax.ShapeDtypeStruct((B, C, N), jnp.bfloat16),
                   jax.ShapeDtypeStruct((B, N, C), jnp.bfloat16),
                   jax.ShapeDtypeStruct((B, C, N), jnp.bfloat16)),
        grid_spec=pltpu.PrefetchScalarGridSpec(
            num_scalar_prefetch=0,
            grid=(B,),
            in_specs=[
                pl.BlockSpec((1, C, N), lambda b: (b, 0, 0)),     # x
                pl.BlockSpec((3 * C, C), lambda b: (0, 0)),       # Wqkv (Wq pre-scaled)
                pl.BlockSpec((3 * C, 1), lambda b: (0, 0)),       # bqkv
                pl.BlockSpec((C, 1), lambda b: (0, 0)),           # gamma
                pl.BlockSpec((C, 1), lambda b: (0, 0)),           # beta
            ],
            out_specs=[
                pl.BlockSpec((1, C, N), lambda b: (b, 0, 0)),     # q  (C, N)
                pl.BlockSpec((1, N, C), lambda b: (b, 0, 0)),     # k  (N, C) pre-transposed
                pl.BlockSpec((1, C, N), lambda b: (b, 0, 0)),     # v  (C, N)
            ]),
        compiler_params=pltpu.CompilerParams(
            dimension_semantics=("parallel",),
            vmem_limit_bytes=vmem1),
        cost_estimate=pl.CostEstimate(
            flops=int(B * (6 * N * C * C + 12 * N * C)),
            transcendentals=int(B * G),
            bytes_accessed=int(B * (N * C * 4 + 3 * N * C * 2) + 3 * C * C * 2 + 3 * C * 4)),
    )(x_bcn, wqkv, bqkv, gamma, beta)

    # ------------------- kernel 2: attention + fused output 1x1 conv -------------------
    out_dtype = jnp.bfloat16        # bf16 writeback; accumulation / out-conv stay f32

    def fast_bytes(tq):             # single-kv-tile path VMEM estimate
        return (4 * (C * tq * 2 + 2 * N * C * 2 + C * C * 2 + C * 4)
                + 2 * C * tq * 2 + N * tq * 8 + C * tq * 12 + (2 << 20))

    def flash_bytes(tq, tkv):       # flash path VMEM estimate
        return (4 * (C * tq * 2 + 2 * tkv * C * 2 + C * C * 2 + C * 4)
                + 2 * C * tq * 2 + tkv * tq * 8 + C * tq * 16 + 8 * tq * 8 + (2 << 20))

    tq_cands = _tile_candidates(N)
    if max_tq is not None:
        lim = [t for t in tq_cands if t <= max_tq]
        tq_cands = lim if lim else [tq_cands[-1]]
    tkv_cands = _tile_candidates(N)
    if max_tkv is not None:
        lim = [t for t in tkv_cands if t <= max_tkv]
        tkv_cands = lim if lim else [tkv_cands[-1]]

    # Prefer Tkv = N (K/V fetched once per batch, no online-softmax rescale).
    tq_fast = None
    if not force_flash and (max_tkv is None or max_tkv >= N):
        for t in tq_cands:
            if fast_bytes(t) <= budget:
                tq_fast = t
                break

    # TODO(synk): mark constant-index blocks (wo/bo and k/v below) single-buffered via
    # pipeline_mode=pl.Buffered(1) once confirmed supported; reclaims VMEM on v7x.
    if tq_fast is not None:
        Tq = tq_fast
        nq = N // Tq
        vmem2 = int(min(max(fast_bytes(Tq) + (4 << 20), 16 << 20), budget))
        attn_bcn = pl.pallas_call(
            _make_attn_single_kernel(use_bf16_exp),
            out_shape=jax.ShapeDtypeStruct((B, C, N), out_dtype),
            grid_spec=pltpu.PrefetchScalarGridSpec(
                num_scalar_prefetch=0,
                grid=(B, nq),
                in_specs=[
                    pl.BlockSpec((1, C, Tq), lambda b, qi: (b, 0, qi)),   # q tile
                    pl.BlockSpec((1, N, C), lambda b, qi: (b, 0, 0)),     # K (all)
                    pl.BlockSpec((1, C, N), lambda b, qi: (b, 0, 0)),     # V (all)
                    pl.BlockSpec((C, C), lambda b, qi: (0, 0)),           # Wo
                    pl.BlockSpec((C, 1), lambda b, qi: (0, 0)),           # bo
                ],
                out_specs=pl.BlockSpec((1, C, Tq), lambda b, qi: (b, 0, qi))),
            compiler_params=pltpu.CompilerParams(
                dimension_semantics=("parallel", "parallel"),
                vmem_limit_bytes=vmem2),
            cost_estimate=pl.CostEstimate(
                flops=int(B * (4 * N * N * C + 2 * N * C * C)),
                transcendentals=int(B * N * N),
                bytes_accessed=int(B * (4 * N * C * 2) + C * C * 2 + C * 4)),
        )(q_bcn, k_bnc, v_bcn, wo, bo)
    else:
        pick = None
        for tkv in tkv_cands:                      # maximize Tkv first
            for tq in tq_cands:
                if flash_bytes(tq, tkv) <= budget:
                    pick = (tq, tkv)
                    break
            if pick is not None:
                break
        if pick is None:
            pick = (tq_cands[-1], tkv_cands[-1])
        Tq, Tkv = pick
        nq, nkv = N // Tq, N // Tkv
        vmem2 = int(min(max(flash_bytes(Tq, Tkv) + (4 << 20), 16 << 20), budget))
        attn_bcn = pl.pallas_call(
            _make_attn_flash_kernel(use_bf16_exp),
            out_shape=jax.ShapeDtypeStruct((B, C, N), out_dtype),
            grid_spec=pltpu.PrefetchScalarGridSpec(
                num_scalar_prefetch=0,
                grid=(B, nq, nkv),
                in_specs=[
                    pl.BlockSpec((1, C, Tq), lambda b, qi, ki: (b, 0, qi)),   # q tile
                    pl.BlockSpec((1, Tkv, C), lambda b, qi, ki: (b, ki, 0)),  # k tile (N, C)
                    pl.BlockSpec((1, C, Tkv), lambda b, qi, ki: (b, 0, ki)),  # v tile (C, N)
                    pl.BlockSpec((C, C), lambda b, qi, ki: (0, 0)),           # Wo
                    pl.BlockSpec((C, 1), lambda b, qi, ki: (0, 0)),           # bo
                ],
                out_specs=pl.BlockSpec((1, C, Tq), lambda b, qi, ki: (b, 0, qi)),
                scratch_shapes=[
                    pltpu.VMEM((1, Tq), jnp.float32),    # running max
                    pltpu.VMEM((1, Tq), jnp.float32),    # running denominator
                    pltpu.VMEM((C, Tq), jnp.float32),    # unnormalized accumulator
                ]),
            compiler_params=pltpu.CompilerParams(
                dimension_semantics=("parallel", "parallel", "arbitrary"),
                vmem_limit_bytes=vmem2),
            cost_estimate=pl.CostEstimate(
                flops=int(B * (4 * N * N * C + 2 * N * C * C)),
                transcendentals=int(B * N * N + B * nq * nkv * N),
                bytes_accessed=int(B * (2 * N * C * 2 + 2 * nq * N * C * 2) + C * C * 2)),
        )(q_bcn, k_bnc, v_bcn, wo, bo)

    attn_out = attn_bcn.reshape(B, C, H, W)

    # Literal PyTorch return: x + h, where h is the integer spatial height (shadowed in
    # the reference forward).  Trivial scalar add, done in XLA.
    lit = x_nchw + jnp.asarray(H, x_nchw.dtype)
    return lit, attn_out


# ---------------------------------------------------------------------------
# Pure-JAX f32 reference mirroring the PyTorch module exactly
# ---------------------------------------------------------------------------
def reference_forward(x_nchw, params):
    B, C, H, W = x_nchw.shape
    G = params["num_groups"]
    eps = 1e-5
    xg = x_nchw.reshape(B, G, C // G, H, W)
    mean = xg.mean(axis=(2, 3, 4), keepdims=True)
    var = ((xg - mean) ** 2).mean(axis=(2, 3, 4), keepdims=True)
    hn = ((xg - mean) / jnp.sqrt(var + eps)).reshape(B, C, H, W)
    hn = hn * params["gamma"].reshape(1, C, 1, 1) + params["beta"].reshape(1, C, 1, 1)

    def conv1x1(t, w, b):
        return jnp.einsum("bchw,oc->bohw", t, w) + b.reshape(1, -1, 1, 1)

    q = conv1x1(hn, params["wq"], params["bq"])
    k = conv1x1(hn, params["wk"], params["bk"])
    v = conv1x1(hn, params["wv"], params["bv"])
    N = H * W
    qf = q.reshape(B, C, N).transpose(0, 2, 1)              # (B, N, C)
    kf = k.reshape(B, C, N)                                 # (B, C, N)
    w_ = jnp.einsum("bnc,bcm->bnm", qf, kf) * (float(C) ** 0.5)
    w_ = jax.nn.softmax(w_, axis=2)
    vf = v.reshape(B, C, N)
    h_ = jnp.einsum("bcn,bmn->bcm", vf, w_)                 # (B, C, N)
    h_ = h_.reshape(B, C, H, W)
    out = conv1x1(h_, params["wo"], params["bo"])
    lit = x_nchw + H
    return lit, out


if __name__ == "__main__":
    B, C, H, W = 2, 32, 16, 16     # N = 256 spatial positions
    G = 8                          # gn_channels (groups); C % G == 0

    key = jax.random.PRNGKey(0)
    ks = jax.random.split(key, 11)
    x = jax.random.normal(ks[0], (B, C, H, W), dtype=jnp.float32)

    params = {
        "num_groups": G,
        "wq": 0.03 * jax.random.normal(ks[1], (C, C), jnp.float32),
        "bq": 0.02 * jax.random.normal(ks[2], (C,), jnp.float32),
        "wk": 0.03 * jax.random.normal(ks[3], (C, C), jnp.float32),
        "bk": 0.02 * jax.random.normal(ks[4], (C,), jnp.float32),
        "wv": 0.10 * jax.random.normal(ks[5], (C, C), jnp.float32),
        "bv": 0.02 * jax.random.normal(ks[6], (C,), jnp.float32),
        "wo": 0.10 * jax.random.normal(ks[7], (C, C), jnp.float32),
        "bo": 0.02 * jax.random.normal(ks[8], (C,), jnp.float32),
        "gamma": 1.0 + 0.05 * jax.random.normal(ks[9], (C,), jnp.float32),
        "beta": 0.05 * jax.random.normal(ks[10], (C,), jnp.float32),
    }

    lit_ref, attn_ref = reference_forward(x, params)

    # Default config: Tkv = N -> single-kv-tile fast kernel (no online-softmax scratch).
    lit, attn_out = attention_block(x, params)
    jax.block_until_ready((lit, attn_out))
    assert jnp.allclose(lit, lit_ref, atol=1e-6, rtol=1e-6), "literal output mismatch"
    err_fast = float(jnp.max(jnp.abs(attn_out.astype(jnp.float32) - attn_ref)))
    assert err_fast < 3e-2, f"fast-path attention mismatch, max abs err {err_fast}"

    # Forced flash path (multi-tile q and kv axes) to exercise the online softmax.
    lit2, attn_out2 = attention_block(x, params, max_tq=128, max_tkv=128, force_flash=True)
    jax.block_until_ready((lit2, attn_out2))
    err_flash = float(jnp.max(jnp.abs(attn_out2.astype(jnp.float32) - attn_ref)))
    assert err_flash < 3e-2, f"flash-path attention mismatch, max abs err {err_flash}"

    print("KERNEL_OK")
</pallas_src>

<mosaic_0001>
module attributes {stable_mosaic.version = 11 : i64} {
  func.func @kernel(%arg0: i32, %arg1: memref<1x32x256xf32, #tpu.memory_space<vmem>>, %arg2: memref<96x32xbf16, #tpu.memory_space<vmem>>, %arg3: memref<96x1xf32, #tpu.memory_space<vmem>>, %arg4: memref<32x1xf32, #tpu.memory_space<vmem>>, %arg5: memref<32x1xf32, #tpu.memory_space<vmem>>, %arg6: memref<1x32x256xbf16, #tpu.memory_space<vmem>>, %arg7: memref<1x256x32xbf16, #tpu.memory_space<vmem>>, %arg8: memref<1x32x256xbf16, #tpu.memory_space<vmem>>) attributes {dimension_semantics = [#tpu.dimension_semantics<parallel>], iteration_bounds = array<i64: 2>, scalar_prefetch = 0 : i64, scratch_operands = 0 : i64, tpu.core_type = #tpu.core_type<tc>, window_params = [{transform_indices = @transform_0, window_bounds = array<i64: 1, 32, 256>}, {pipeline_mode = #tpu.pipeline_mode<synchronous>, transform_indices = @transform_1, window_bounds = array<i64: 96, 32>}, {pipeline_mode = #tpu.pipeline_mode<synchronous>, transform_indices = @transform_2, window_bounds = array<i64: 96, 1>}, {pipeline_mode = #tpu.pipeline_mode<synchronous>, transform_indices = @transform_3, window_bounds = array<i64: 32, 1>}, {pipeline_mode = #tpu.pipeline_mode<synchronous>, transform_indices = @transform_4, window_bounds = array<i64: 32, 1>}, {transform_indices = @transform_5, window_bounds = array<i64: 1, 32, 256>}, {transform_indices = @transform_6, window_bounds = array<i64: 1, 256, 32>}, {transform_indices = @transform_7, window_bounds = array<i64: 1, 32, 256>}]} {
    %c0 = arith.constant 0 : index
    %c0_0 = arith.constant 0 : index
    %c0_1 = arith.constant 0 : index
    %0 = vector.load %arg1[%c0, %c0_0, %c0_1] : memref<1x32x256xf32, #tpu.memory_space<vmem>>, vector<1x32x256xf32>
    %1 = vector.shape_cast %0 : vector<1x32x256xf32> to vector<32x256xf32>
    %2 = tpu.iota {dimensions = array<i32: 0>} : vector<8x32xi32>
    %3 = tpu.iota {dimensions = array<i32: 1>} : vector<8x32xi32>
    %c4_i32 = arith.constant 4 : i32
    %4 = vector.broadcast %c4_i32 : i32 to vector<8x32xi32>
    %5 = arith.muli %2, %4 : vector<8x32xi32>
    %6 = arith.cmpi sge, %3, %5 : vector<8x32xi32>
    %c1_i32 = arith.constant 1 : i32
    %7 = vector.broadcast %c1_i32 : i32 to vector<8x32xi32>
    %8 = arith.addi %2, %7 : vector<8x32xi32>
    %c4_i32_2 = arith.constant 4 : i32
    %9 = vector.broadcast %c4_i32_2 : i32 to vector<8x32xi32>
    %10 = arith.muli %8, %9 : vector<8x32xi32>
    %11 = arith.cmpi slt, %3, %10 : vector<8x32xi32>
    %12 = arith.andi %6, %11 : vector<8x32xi1>
    %13 = arith.extui %12 : vector<8x32xi1> to vector<8x32xi32>
    %14 = arith.sitofp %13 : vector<8x32xi32> to vector<8x32xf32>
    %15 = tpu.iota {dimensions = array<i32: 0>} : vector<32x8xi32>
    %16 = tpu.iota {dimensions = array<i32: 1>} : vector<32x8xi32>
    %c4_i32_3 = arith.constant 4 : i32
    %17 = vector.broadcast %c4_i32_3 : i32 to vector<32x8xi32>
    %18 = arith.muli %16, %17 : vector<32x8xi32>
    %19 = arith.cmpi sge, %15, %18 : vector<32x8xi32>
    %c1_i32_4 = arith.constant 1 : i32
    %20 = vector.broadcast %c1_i32_4 : i32 to vector<32x8xi32>
    %21 = arith.addi %16, %20 : vector<32x8xi32>
    %c4_i32_5 = arith.constant 4 : i32
    %22 = vector.broadcast %c4_i32_5 : i32 to vector<32x8xi32>
    %23 = arith.muli %21, %22 : vector<32x8xi32>
    %24 = arith.cmpi slt, %15, %23 : vector<32x8xi32>
    %25 = arith.andi %19, %24 : vector<32x8xi1>
    %26 = arith.extui %25 : vector<32x8xi1> to vector<32x8xi32>
    %27 = arith.sitofp %26 : vector<32x8xi32> to vector<32x8xf32>
    %cst = arith.constant dense<0.000000e+00> : vector<8x256xf32>
    %28 = tpu.matmul %14, %1, %cst {dimension_numbers = #tpu.dot_dimension_numbers<[1], [0], [0], [1], [0, 0, 1, 1], [], []>} : vector<8x32xf32>, vector<32x256xf32>, vector<8x256xf32> -> vector<8x256xf32>
    %29 = arith.mulf %1, %1 : vector<32x256xf32>
    %cst_6 = arith.constant dense<0.000000e+00> : vector<8x256xf32>
    %30 = tpu.matmul %14, %29, %cst_6 {dimension_numbers = #tpu.dot_dimension_numbers<[1], [0], [0], [1], [0, 0, 1, 1], [], []>} : vector<8x32xf32>, vector<32x256xf32>, vector<8x256xf32> -> vector<8x256xf32>
    %cst_7 = arith.constant dense<0.000000e+00> : vector<8xf32>
    %31 = vector.multi_reduction <add>, %28, %cst_7 [1] : vector<8x256xf32> to vector<8xf32>
    %32 = vector.shape_cast %31 : vector<8xf32> to vector<8x1xf32>
    %cst_8 = arith.constant dense<0.000000e+00> : vector<8xf32>
    %33 = vector.multi_reduction <add>, %30, %cst_8 [1] : vector<8x256xf32> to vector<8xf32>
    %34 = vector.shape_cast %33 : vector<8xf32> to vector<8x1xf32>
    %cst_9 = arith.constant 1.024000e+03 : f32
    %35 = vector.broadcast %cst_9 : f32 to vector<8x1xf32>
    %36 = arith.divf %32, %35 : vector<8x1xf32>
    %cst_10 = arith.constant 1.024000e+03 : f32
    %37 = vector.broadcast %cst_10 : f32 to vector<8x1xf32>
    %38 = arith.divf %34, %37 : vector<8x1xf32>
    %39 = arith.mulf %36, %36 : vector<8x1xf32>
    %40 = arith.subf %38, %39 : vector<8x1xf32>
    %cst_11 = arith.constant 0.000000e+00 : f32
    %41 = vector.broadcast %cst_11 : f32 to vector<8x1xf32>
    %42 = arith.maximumf %40, %41 : vector<8x1xf32>
    %cst_12 = arith.constant 9.99999974E-6 : f32
    %43 = vector.broadcast %cst_12 : f32 to vector<8x1xf32>
    %44 = arith.addf %42, %43 : vector<8x1xf32>
    %45 = math.rsqrt %44 : vector<8x1xf32>
    %cst_13 = arith.constant 0.000000e+00 : f32
    %46 = vector.broadcast %cst_13 : f32 to vector<8x1xf32>
    %47 = arith.subf %46, %36 : vector<8x1xf32>
    %48 = arith.mulf %47, %45 : vector<8x1xf32>
    %49 = vector.shape_cast %45 : vector<8x1xf32> to vector<8x1xf32>
    %50 = vector.broadcast %49 : vector<8x1xf32> to vector<8x256xf32>
    %cst_14 = arith.constant dense<0.000000e+00> : vector<32x256xf32>
    %51 = tpu.matmul %27, %50, %cst_14 {dimension_numbers = #tpu.dot_dimension_numbers<[1], [0], [0], [1], [0, 0, 1, 1], [], []>} : vector<32x8xf32>, vector<8x256xf32>, vector<32x256xf32> -> vector<32x256xf32>
    %52 = vector.shape_cast %48 : vector<8x1xf32> to vector<8x1xf32>
    %53 = vector.broadcast %52 : vector<8x1xf32> to vector<8x256xf32>
    %cst_15 = arith.constant dense<0.000000e+00> : vector<32x256xf32>
    %54 = tpu.matmul %27, %53, %cst_15 {dimension_numbers = #tpu.dot_dimension_numbers<[1], [0], [0], [1], [0, 0, 1, 1], [], []>} : vector<32x8xf32>, vector<8x256xf32>, vector<32x256xf32> -> vector<32x256xf32>
    %55 = arith.mulf %1, %51 : vector<32x256xf32>
    %56 = arith.addf %55, %54 : vector<32x256xf32>
    %c0_16 = arith.constant 0 : index
    %c0_17 = arith.constant 0 : index
    %57 = vector.load %arg4[%c0_16, %c0_17] : memref<32x1xf32, #tpu.memory_space<vmem>>, vector<32x1xf32>
    %58 = vector.broadcast %57 : vector<32x1xf32> to vector<32x256xf32>
    %59 = arith.mulf %56, %58 : vector<32x256xf32>
    %c0_18 = arith.constant 0 : index
    %c0_19 = arith.constant 0 : index
    %60 = vector.load %arg5[%c0_18, %c0_19] : memref<32x1xf32, #tpu.memory_space<vmem>>, vector<32x1xf32>
    %61 = vector.broadcast %60 : vector<32x1xf32> to vector<32x256xf32>
    %62 = arith.addf %59, %61 : vector<32x256xf32>
    %63 = arith.truncf %62 : vector<32x256xf32> to vector<32x256xbf16>
    %c0_20 = arith.constant 0 : index
    %c0_21 = arith.constant 0 : index
    %64 = vector.load %arg2[%c0_20, %c0_21] : memref<96x32xbf16, #tpu.memory_space<vmem>>, vector<96x32xbf16>
    %cst_22 = arith.constant dense<0.000000e+00> : vector<96x256xf32>
    %65 = tpu.matmul %64, %63, %cst_22 {dimension_numbers = #tpu.dot_dimension_numbers<[1], [0], [0], [1], [0, 0, 1, 1], [], []>} : vector<96x32xbf16>, vector<32x256xbf16>, vector<96x256xf32> -> vector<96x256xf32>
    %c0_23 = arith.constant 0 : index
    %c0_24 = arith.constant 0 : index
    %66 = vector.load %arg3[%c0_23, %c0_24] : memref<96x1xf32, #tpu.memory_space<vmem>>, vector<96x1xf32>
    %67 = vector.broadcast %66 : vector<96x1xf32> to vector<96x256xf32>
    %68 = arith.addf %65, %67 : vector<96x256xf32>
    %69 = vector.extract_strided_slice %68 {offsets = [0, 0], sizes = [32, 256], strides = [1, 1]} : vector<96x256xf32> to vector<32x256xf32>
    %70 = arith.truncf %69 : vector<32x256xf32> to vector<32x256xbf16>
    %c0_25 = arith.constant 0 : index
    %c0_26 = arith.constant 0 : index
    %c0_27 = arith.constant 0 : index
    %71 = vector.load %arg6[%c0_25, %c0_26, %c0_27] : memref<1x32x256xbf16, #tpu.memory_space<vmem>>, vector<1x32x256xbf16>
    %72 = vector.shape_cast %71 : vector<1x32x256xbf16> to vector<32x256xbf16>
    %73 = vector.shape_cast %70 : vector<32x256xbf16> to vector<1x32x256xbf16>
    tpu.vector_store %arg6[%c0_25, %c0_26, %c0_27], %73 {strides = array<i32>} : memref<1x32x256xbf16, #tpu.memory_space<vmem>>, vector<1x32x256xbf16>,
    %74 = vector.extract_strided_slice %68 {offsets = [32, 0], sizes = [32, 256], strides = [1, 1]} : vector<96x256xf32> to vector<32x256xf32>
    %75 = tpu.transpose %74, [1, 0] : vector<32x256xf32> -> vector<256x32xf32>
    %76 = arith.truncf %75 : vector<256x32xf32> to vector<256x32xbf16>
    %c0_28 = arith.constant 0 : index
    %c0_29 = arith.constant 0 : index
    %c0_30 = arith.constant 0 : index
    %77 = vector.load %arg7[%c0_28, %c0_29, %c0_30] : memref<1x256x32xbf16, #tpu.memory_space<vmem>>, vector<1x256x32xbf16>
    %78 = vector.shape_cast %77 : vector<1x256x32xbf16> to vector<256x32xbf16>
    %79 = vector.shape_cast %76 : vector<256x32xbf16> to vector<1x256x32xbf16>
    tpu.vector_store %arg7[%c0_28, %c0_29, %c0_30], %79 {strides = array<i32>} : memref<1x256x32xbf16, #tpu.memory_space<vmem>>, vector<1x256x32xbf16>,
    %80 = vector.extract_strided_slice %68 {offsets = [64, 0], sizes = [32, 256], strides = [1, 1]} : vector<96x256xf32> to vector<32x256xf32>
    %81 = arith.truncf %80 : vector<32x256xf32> to vector<32x256xbf16>
    %c0_31 = arith.constant 0 : index
    %c0_32 = arith.constant 0 : index
    %c0_33 = arith.constant 0 : index
    %82 = vector.load %arg8[%c0_31, %c0_32, %c0_33] : memref<1x32x256xbf16, #tpu.memory_space<vmem>>, vector<1x32x256xbf16>
    %83 = vector.shape_cast %82 : vector<1x32x256xbf16> to vector<32x256xbf16>
    %84 = vector.shape_cast %81 : vector<32x256xbf16> to vector<1x32x256xbf16>
    tpu.vector_store %arg8[%c0_31, %c0_32, %c0_33], %84 {strides = array<i32>} : memref<1x32x256xbf16, #tpu.memory_space<vmem>>, vector<1x32x256xbf16>,
    return
  }
  func.func @transform_0(%arg0: i32) -> (i32, i32, i32) {
    %c0_i32 = arith.constant 0 : i32
    %c0_i32_0 = arith.constant 0 : i32
    %c0_i32_1 = arith.constant 0 : i32
    return %arg0, %c0_i32, %c0_i32_0 : i32, i32, i32
  }
  func.func @transform_1(%arg0: i32) -> (i32, i32) {
    %c0_i32 = arith.constant 0 : i32
    %c0_i32_0 = arith.constant 0 : i32
    %c0_i32_1 = arith.constant 0 : i32
    return %c0_i32, %c0_i32_0 : i32, i32
  }
  func.func @transform_2(%arg0: i32) -> (i32, i32) {
    %c0_i32 = arith.constant 0 : i32
    %c0_i32_0 = arith.constant 0 : i32
    %c0_i32_1 = arith.constant 0 : i32
    return %c0_i32, %c0_i32_0 : i32, i32
  }
  func.func @transform_3(%arg0: i32) -> (i32, i32) {
    %c0_i32 = arith.constant 0 : i32
    %c0_i32_0 = arith.constant 0 : i32
    %c0_i32_1 = arith.constant 0 : i32
    return %c0_i32, %c0_i32_0 : i32, i32
  }
  func.func @transform_4(%arg0: i32) -> (i32, i32) {
    %c0_i32 = arith.constant 0 : i32
    %c0_i32_0 = arith.constant 0 : i32
    %c0_i32_1 = arith.constant 0 : i32
    return %c0_i32, %c0_i32_0 : i32, i32
  }
  func.func @transform_5(%arg0: i32) -> (i32, i32, i32) {
    %c0_i32 = arith.constant 0 : i32
    %c0_i32_0 = arith.constant 0 : i32
    %c0_i32_1 = arith.constant 0 : i32
    return %arg0, %c0_i32, %c0_i32_0 : i32, i32, i32
  }
  func.func @transform_6(%arg0: i32) -> (i32, i32, i32) {
    %c0_i32 = arith.constant 0 : i32
    %c0_i32_0 = arith.constant 0 : i32
    %c0_i32_1 = arith.constant 0 : i32
    return %arg0, %c0_i32, %c0_i32_0 : i32, i32, i32
  }
  func.func @transform_7(%arg0: i32) -> (i32, i32, i32) {
    %c0_i32 = arith.constant 0 : i32
    %c0_i32_0 = arith.constant 0 : i32
    %c0_i32_1 = arith.constant 0 : i32
    return %arg0, %c0_i32, %c0_i32_0 : i32, i32, i32
  }
}

</mosaic_0001>

<bundles_post_ra>
// kernel: tpu_custom_call.1
= control target key start
LH: loop header
LB: loop body
LE: loop exit
PB: predicated region body
PF: predicated region fallthrough
CT: control target
= control target key end

     0   :  { %s2334_s0 = inlined_call_operand.vmem [shape: f32[2,32,256], index: 0, kind: input, shape index: {}]   ;;  %s2335_s1 = inlined_call_operand.vmem [shape: bf16[96,32], index: 1, kind: input, shape index: {}]   ;;  %s2336_s2 = inlined_call_operand.vmem [shape: f32[96,1], index: 2, kind: input, shape index: {}]   ;;  %s2337_s3 = inlined_call_operand.vmem [shape: f32[32,1], index: 3, kind: input, shape index: {}]   ;;  %s2338_s4 = inlined_call_operand.vmem [shape: f32[32,1], index: 4, kind: input, shape index: {}]   ;;  %s2339_s5 = inlined_call_operand.hbm [shape: bf16[2,32,256], index: 5, kind: output, shape index: {0}]   ;;  %s2340_s6 = inlined_call_operand.vmem [shape: bf16[2,256,32], index: 6, kind: output, shape index: {1}]   ;;  %s2341_s7 = inlined_call_operand.hbm [shape: bf16[2,32,256], index: 7, kind: output, shape index: {2}]  }
   0x1   :  { %2342 = sst [smem:[#allocation8_spill]] %s2334_s0 }
   0x2   :  { %13 = vsyncpa [#allocation3], 0 }
   0x3   :  { %15 = vsyncpa [#allocation3 + $0x1], 0 }
   0x4   :  { %16 = vsyncpa [#allocation5], 0 }
   0x5   :  { %18 = vsyncpa [#allocation5 + $0x1], 0  ;;  %s1897_s24 = smov 0   ;;  %s1899_s25 = smov 0  }
   0x6   :  { %s1901_s26 = smov 0   ;;  %s1903_s27 = smov 0  }
   0x7 LB: > { %s1918_s28 = sadd.s32 4294967295, %s1849_s27   ;;  %s1460_s29 = sadd.s32 4294967294, %s1849_s27   ;;  %s1849_s27 = sphi %s1903_s27, %s2351_s27   ;;  %s1845_s26 = sphi %s1901_s26, %s2350_s26   ;;  %s1841_s25 = sphi %s1899_s25, %s2349_s25   ;;  %s1837_s24 = sphi %s1897_s24, %s2348_s24  }
   0x8   : > { %s1922_s30 = sadd.s32 1, %s1849_s27   ;;  %s141_s8 = sadd.s32 1, %s1845_s26 }
   0x9   : > { %s138_s9 = ssub.s32 %s1849_s27, %s1922_s30  ;;  %p151_p0 = scmp.ne.s32.totalorder %s1845_s26, %s1841_s25 }
   0xa   : > { %p139_p1 = scmp.eq.s32.totalorder %s138_s9, 0  ;;  %p152_p2 = scmp.eq.s32.totalorder %s1918_s28, 1 }
   0xb   : > { %p157_p3 = scmp.ne.s32.totalorder %s1841_s25, %s1837_s24  ;;  %p158_p4 = scmp.eq.s32.totalorder %s1460_s29, 1 }
   0xc   : > { %s1933_s10 = scalar_select %p139_p1, %s1845_s26, %s141_s8  }
   0xd   : > { %p1935_p5 = por %p152_p2, %p151_p0  ;;  %p1939_p6 = por %p158_p4, %p157_p3 }
   0xe   : > { %p1463_p7 = scmp.ge.s32.totalorder %s1849_s27, 1  ;;  %p248_p8 = scmp.lt.s32.totalorder %s1849_s27, 3 }
  0x10   : > { %p249_p9 = pnand %p1463_p7, %p248_p8 }
  0x11   : > { %p290_p10 = scmp.lt.s32.totalorder (!%p249_p9), %s1918_s28, 1  ;;  %v309_v0 = vlaneseq (!%p249_p9)  ;;  %v1851_v1 = vmov (!%p249_p9), 0.0   ;;  %s2345_s0 = sld [smem:[#allocation8_spill]] (!%p249_p9)  ;;  %vm347_vm3 = vcmask (!%p249_p9), 261120   ;;  %v724_v39 = vld [vmem:[%s2337_s3] sm:$0xff] (!%p249_p9)  ;;  %v1852_v40 = vmov (!%p249_p9), 0  }
  0x12   : > { %252 = sbr.rel (%p249_p9) target bundleno = 1088 (0x440), region = 40  ;;  %415 = vmatprep.mubr.f32.mxu0 (!%p249_p9), %v1851_v1  ;;  %494 = vmatprep.mubr.f32.mxu1 (!%p249_p9), %v1851_v1  ;;  %v725_v41 = vld [vmem:[%s2337_s3 + $0x8] sm:$0xff] (!%p249_p9)  ;;  %v756_v42 = vld [vmem:[%s2338_s4] sm:$0xff] (!%p249_p9)  ;;  %v806_v44 = vld [vmem:[%s2336_s2 + $0x10] sm:$0xff] (!%p249_p9)  ;;  %vm517_vm9 = vcmask (!%p249_p9), 64512   ;;  %s2144_s18 = sand.u32 (!%p249_p9), 1, %s1841_s25  }
  0x13   : > { %v1951_v2 = vshrl.u32 (!%p249_p9), %v309_v0, 7  ;;  %v1953_v3 = vand.u32 (!%p249_p9), 127, %v309_v0  ;;  %1657 = vset.pattern.permute.xlu1 (!%p249_p9), %v1852_v40  ;;  %1658 = vset.pattern.permute.xlu0 (!%p249_p9), %v1852_v40  ;;  %v757_v43 = vld [vmem:[%s2338_s4 + $0x8] sm:$0xff] (!%p249_p9)  ;;  %v726_v45 = vld [vmem:[%s2337_s3 + $0x10] sm:$0xff] (!%p249_p9)  ;;  %v812_v46 = vld [vmem:[%s2336_s2 + $0x40] sm:$0xff] (!%p249_p9)  ;;  %s1464_s19 = sshll.u32 (!%p249_p9), %s2144_s18, 5 }
  0x14   : > { %730 = vperm.xlu1 (!%p249_p9), %1657, %v724_v39   ;;  %v727_v47 = vld [vmem:[%s2337_s3 + $0x18] sm:$0xff] (!%p249_p9)  ;;  %v814_v48 = vld [vmem:[%s2336_s2 + $0x50] sm:$0xff] (!%p249_p9)  ;;  %v808_v51 = vld [vmem:[%s2336_s2 + $0x20] sm:$0xff] (!%p249_p9)  ;;  %s2157_s20 = scalar_lea.vmem (!%p249_p9), [#allocation2], %s1464_s19  ;;  %s2165_s21 = scalar_lea.vmem (!%p249_p9), [#allocation4], %s1464_s19 }
  0x15   : > { %v313_v4 = vmul.u32 (!%p249_p9), 4, %v1951_v2  ;;  %v315_v5 = vadd.s32 (!%p249_p9), 1, %v1951_v2  ;;  %v758_v49 = vld [vmem:[%s2338_s4 + $0x10] sm:$0xff] (!%p249_p9)  ;;  %v759_v50 = vld [vmem:[%s2338_s4 + $0x18] sm:$0xff] (!%p249_p9)  ;;  %v809_v52 = vld [vmem:[%s2336_s2 + $0x28] sm:$0xff] (!%p249_p9)  ;;  %v329_v9 = vadd.s32 (!%p249_p9), 1, %v1953_v3 }
  0x16   : > { %v810_v53 = vld [vmem:[%s2336_s2 + $0x30] sm:$0xff] (!%p249_p9)  ;;  %v811_v54 = vld [vmem:[%s2336_s2 + $0x38] sm:$0xff] (!%p249_p9)  ;;  %v804_v55 = vld [vmem:[%s2336_s2] sm:$0xff] (!%p249_p9)  ;;  %s1322_s22 = sshll.u32 (!%p249_p9), %s2157_s20, 4  ;;  %s1341_s23 = sshll.u32 (!%p249_p9), %s2165_s21, 4  ;;  %s2178_s22 = int_to_ptr.vmem [resolvable:$true] %s1322_s22  ;;  %s2180_s23 = int_to_ptr.vmem [resolvable:$true] %s1341_s23 }
  0x17   : > { %vm1968_vm0 = vcmp.ge.s32.totalorder (!%p249_p9), %v1953_v3, %v313_v4  ;;  %v316_v10 = vmul.u32 (!%p249_p9), 4, %v315_v5  ;;  %v805_v56 = vld [vmem:[%s2336_s2 + $0x8] sm:$0xff] (!%p249_p9)  ;;  %v807_v57 = vld [vmem:[%s2336_s2 + $0x18] sm:$0xff] (!%p249_p9)  ;;  %s1587_s29 = sshll.u32 (!%p249_p9), %s1918_s28, 9  ;;  %s1299_s19 = scalar_lea.sflag (!%p249_p9), [#allocation3], %s2144_s18 }
  0x18   : > { %735 = vperm.xlu1 (!%p249_p9), %1657, %v725_v41   ;;  %v813_v58 = vld [vmem:[%s2336_s2 + $0x48] sm:$0xff] (!%p249_p9)  ;;  %v815_v59 = vld [vmem:[%s2336_s2 + $0x58] sm:$0xff] (!%p249_p9) }
  0x19   : > { %s1949_s13 = scalar_select %p290_p10, %s1918_s28, 1  ;;  %vm317_vm1 = vcmp.lt.s32.totalorder %v1953_v3, %v316_v10 }
  0x1a   : > { %vm318_vm2 = vmand %vm1968_vm0, %vm317_vm1 }
  0x1b   : > { %s1545_s14 = sshll.u32 %s1949_s13, 6  ;;  %v1470_v32 = vsel %vm318_vm2, 1.0, %v1851_v1 }
  0x1c   : > { %s294_s17 = scalar_lea.vmem %s2345_s0, %s1545_s14  ;;  %767 = vperm.xlu1 %1657, %v757_v43   ;;  %s2186_s14 = scalar_lea.hbm %s2339_s5, %s1587_s29 }
  0x1d   : > { %v1961_v6 = vld [vmem:[%s294_s17 + $0x8] sm:$0xff]  ;;  %v1963_v7 = vld [vmem:[%s294_s17 + $0x18] sm:$0xff]  ;;  %v1965_v8 = vld [vmem:[%s294_s17] sm:$0xff] }
  0x1e   : > { %v1589_v11 = vpack.c.bf16 %v1963_v7, %v1961_v6  ;;  %v1974_v12 = vld [vmem:[%s294_s17 + $0x10] sm:$0xff]  ;;  %v423_v13 = vmul.f32 %v1961_v6, %v1961_v6  ;;  %v425_v14 = vmul.f32 %v1963_v7, %v1963_v7  ;;  %v1980_v15 = vld [vmem:[%s294_s17 + $0x28] sm:$0xff]  ;;  %v1982_v16 = vld [vmem:[%s294_s17 + $0x38] sm:$0xff]  ;;  %v422_v17 = vmul.f32 %v1965_v8, %v1965_v8 }
  0x1f   : > { %v1591_v18 = vpack.c.bf16 %v1974_v12, %v1965_v8  ;;  %v1593_v19 = vpack.c.bf16 %v1982_v16, %v1980_v15  ;;  %v424_v20 = vmul.f32 %v1974_v12, %v1974_v12  ;;  %v1992_v21 = vld [vmem:[%s294_s17 + $0x20] sm:$0xff]  ;;  %v1994_v22 = vld [vmem:[%s294_s17 + $0x30] sm:$0xff]  ;;  %v427_v23 = vmul.f32 %v1980_v15, %v1980_v15  ;;  %s2191_s17 = scalar_lea.hbm %s2341_s7, %s1587_s29 }
  0x20   : > { %1590 = vmatprep.subr.bf16.mxu0 %v1589_v11  ;;  %v1597_v24 = vpack.c.bf16 %v425_v14, %v423_v13  ;;  %v429_v25 = vmul.f32 %v1982_v16, %v1982_v16  ;;  %v1595_v27 = vpack.c.bf16 %v1994_v22, %v1992_v21  ;;  %v426_v28 = vmul.f32 %v1992_v21, %v1992_v21 }
  0x21   : > { %1592 = vmatpush1.bf16.msra.mxu0 %v1591_v18  ;;  %v1599_v26 = vpack.c.bf16 %v424_v20, %v422_v17  ;;  %v428_v29 = vmul.f32 %v1994_v22, %v1994_v22  ;;  %740 = vperm.xlu1 %1657, %v726_v45   ;;  %v324_v11 = vmul.u32 4, %v1953_v3  ;;  %v330_v13 = vmul.u32 4, %v329_v9 }
  0x22   : > { %1598 = vmatprep.subr.bf16.mxu1 %v1597_v24  ;;  %1594 = vmatprep.subr.bf16.mxu0 %v1593_v19  ;;  %v1601_v30 = vpack.c.bf16 %v429_v25, %v427_v23  ;;  %v321_v14 = vadd.s32 8, %v1951_v2  ;;  %v322_v17 = vadd.s32 16, %v1951_v2  ;;  %v323_v3 = vadd.s32 24, %v1951_v2 }
  0x23   : > { %1600 = vmatpush1.bf16.msra.mxu1 %v1599_v26  ;;  %v1603_v31 = vpack.c.bf16 %v428_v29, %v426_v28  ;;  %vm325_vm4 = vcmp.ge.s32.totalorder %v1951_v2, %v324_v11  ;;  %vm331_vm5 = vcmp.lt.s32.totalorder %v1951_v2, %v330_v13 }
  0x24   : > { %1602 = vmatprep.subr.bf16.mxu1 %v1601_v30  ;;  %vm335_vm6 = vmand %vm325_vm4, %vm331_vm5  ;;  %vm326_vm7 = vcmp.ge.s32.totalorder %v321_v14, %v324_v11  ;;  %vm332_vm8 = vcmp.lt.s32.totalorder %v321_v14, %v330_v13  ;;  %vm327_vm11 = vcmp.ge.s32.totalorder %v322_v17, %v324_v11  ;;  %vm333_vm12 = vcmp.lt.s32.totalorder %v322_v17, %v330_v13 }
  0x25   : > { %1596 = vmatpush1.bf16.msra.mxu0 %v1595_v27  ;;  %745 = vperm.xlu1 %1657, %v727_v47   ;;  %v1471_v20 = vsel %vm335_vm6, 1.0, %v1851_v1  ;;  %vm336_vm10 = vmand %vm326_vm7, %vm332_vm8  ;;  %vm328_vm14 = vcmp.ge.s32.totalorder %v323_v3, %v324_v11  ;;  %vm334_vm15 = vcmp.lt.s32.totalorder %v323_v3, %v330_v13 }
  0x26   : > { %v1472_v24 = vsel %vm336_vm10, 1.0, %v1851_v1  ;;  %vm337_vm13 = vmand %vm327_vm11, %vm333_vm12 }
  0x27   : > { %1604 = vmatpush1.bf16.msra.mxu1 %v1603_v31  ;;  %v1473_v2 = vsel %vm337_vm13, 1.0, %v1851_v1  ;;  %vm338_vm0 = vmand %vm328_vm14, %vm334_vm15 }
  0x28   : > { %1475 = vmatmul.mubr.msk.f32.vlgmr.msra.gmra.mrb[0].mxu0 %vm347_vm3, %v1470_v32  ;;  %v1474_v25 = vsel %vm338_vm0, 1.0, %v1851_v1 }
  0x29   : > { %594 = vmatprep.mubr.f32.mxu0 %v1851_v1  ;;  %772 = vperm.xlu1 %1657, %v758_v49  }
  0x2a   : > { %1476 = vmatmul.mubr.msk.f32.vlgmr.msra.gmra.mrb[0].mxu1 %vm347_vm3, %v1470_v32 }
  0x2b   : > { %683 = vmatprep.mubr.f32.mxu1 %v1851_v1 }
  0x2d   : > { %777 = vperm.xlu1 %1657, %v759_v50  }
  0x31   : > { %838 = vperm.xlu1 %1657, %v808_v51  }
  0x35   : > { %843 = vperm.xlu1 %1657, %v809_v52  }
  0x39   : > { %848 = vperm.xlu1 %1657, %v810_v53  }
  0x3d   : > { %853 = vperm.xlu1 %1657, %v811_v54  }
  0x41   : > { %818 = vperm.xlu1 %1657, %v804_v55  }
  0x45   : > { %823 = vperm.xlu1 %1657, %v805_v56  }
  0x49   : > { %833 = vperm.xlu1 %1657, %v807_v57  }
  0x4d   : > { %863 = vperm.xlu1 %1657, %v813_v58  }
  0x51   : > { %873 = vperm.xlu1 %1657, %v815_v59  }
  0x93   : > { %v731_v26 = vpop.permute.xlu1 %730 }
  0x97   : > { %v736_v27 = vpop.permute.xlu1 %735 }
  0x9b   : > { %v768_v28 = vpop.permute.xlu1 %767 }
  0xa0   : > { %v741_v29 = vpop.permute.xlu1 %740 }
  0xa4   : > { %v746_v41 = vpop.permute.xlu1 %745 }
  0xa8   : > { %v773_v57 = vpop.permute.xlu1 %772 }
  0xac   : > { %v778_v17 = vpop.permute.xlu1 %777 }
  0xfb   : > { %v417_v33 = vpop.f32.mrb[0].mxu0 }
  0xfc   : > { %v419_v34 = vpop.f32.mrb[1].mxu0 }
  0xfd   : > { %v496_v35 = vpop.f32.mrb[0].mxu1  ;;  %v501_v36 = vadd.f32 %v419_v34, %v417_v33 }
  0xfe   : > { %v498_v37 = vpop.f32.mrb[1].mxu1 }
  0xff   : > { %v504_v38 = vadd.f32 %v498_v37, %v496_v35  ;;  %502 = vadd.xlane.f32.xlu0 %v501_v36 }
 0x103   : > { %505 = vadd.xlane.f32.xlu0 %v504_v38 }
 0x119   : > { %762 = vperm.xlu0 %1658, %v756_v42  }
 0x11d   : > { %828 = vperm.xlu0 %1658, %v806_v44  }
 0x121   : > { %858 = vperm.xlu0 %1658, %v812_v46  }
 0x125   : > { %868 = vperm.xlu0 %1658, %v814_v48  }
 0x18c   : > { %v503_v60 = vpop.xlane.xlu0 %502 }
 0x18d   : > { %v508_v61 = vmul.f32 0.0009765625, %v503_v60 }
 0x18f   : > { %v510_v63 = vmul.f32 %v508_v61, %v508_v61  ;;  %v515_v18 = vsub.f32 0.0, %v508_v61 }
 0x190   : > { %v506_v62 = vpop.xlane.xlu0 %505 }
 0x191   : > { %v509_v0 = vmul.f32 0.0009765625, %v506_v62 }
 0x193   : > { %v511_v4 = vsub.f32 %v509_v0, %v510_v63 }
 0x195   : > { %v512_v5 = vmax.f32 %v511_v4, 0.0 }
 0x197   : > { %v513_v10 = vadd.f32 1e-05, %v512_v5 }
 0x198   : > { %v763_v51 = vpop.permute.xlu0 %762 }
 0x199   : > { %1753 = vrsqrt.f32 %v513_v10 }
 0x1a3   : > { %v1754_v19 = vpop.eup %1753 }
 0x1a4   : > { %530 = vmatprep.subr.mxu0 %v1754_v19  ;;  %v516_v23 = vmul.f32 %v1754_v19, %v515_v18 }
 0x1a5   : > { %531 = vmatpush1.msra.mxu0 %v1754_v19 }
 0x1a6   : > { %1477 = vmatmul.mubr.msk.f32.vlgmr.msra.gmra.mrb[2].mxu0 %vm517_vm9, %v1471_v20  ;;  %619 = vmatprep.subr.mxu1 %v516_v23 }
 0x1a7   : > { %620 = vmatpush1.msra.mxu1 %v516_v23  ;;  %600 = vmatprep.mubr.f32.mxu0 %v1851_v1 }
 0x1a8   : > { %1481 = vmatmul.mubr.msk.f32.vlgmr.msra.gmra.mrb[2].mxu1 %vm517_vm9, %v1471_v20 }
 0x1a9   : > { %689 = vmatprep.mubr.f32.mxu1 %v1851_v1 }
 0x1aa   : > { %1478 = vmatmul.mubr.msk.f32.gmra.mrb[4].mxu0 %vm517_vm9, %v1472_v24 }
 0x1ab   : > { %606 = vmatprep.mubr.f32.mxu0 %v1851_v1 }
 0x1ac   : > { %1482 = vmatmul.mubr.msk.f32.gmra.mrb[4].mxu1 %vm517_vm9, %v1472_v24  ;;  %v1747_v24 = vld [vmem:[%s2335_s1] sm:$0xff]  }
 0x1ad   : > { %695 = vmatprep.mubr.f32.mxu1 %v1851_v1 }
 0x1ae   : > { %1479 = vmatmul.mubr.msk.f32.gmra.mrb[6].mxu0 %vm517_vm9, %v1473_v2 }
 0x1af   : > { %612 = vmatprep.mubr.f32.mxu0 %v1851_v1 }
 0x1b0   : > { %1483 = vmatmul.mubr.msk.f32.gmra.mrb[6].mxu1 %vm517_vm9, %v1473_v2  ;;  %v1748_v2 = vld [vmem:[%s2335_s1 + $0x18] sm:$0xff]  }
 0x1b1   : > { %701 = vmatprep.mubr.f32.mxu1 %v1851_v1 }
 0x1b2   : > { %1480 = vmatmul.mubr.msk.f32.gmra.mrb[8].mxu0 %vm517_vm9, %v1474_v25 }
 0x1b3   : > { %956 = vmatprep.mubr.bf16.mxu0 %v1852_v40 }
 0x1b4   : > { %1484 = vmatmul.mubr.msk.f32.gmra.mrb[8].mxu1 %vm517_vm9, %v1474_v25  ;;  %v1749_v25 = vld [vmem:[%s2335_s1 + $0x8] sm:$0xff]  }
 0x1b5   : > { %986 = vmatprep.mubr.bf16.mxu1 %v1852_v40 }
 0x279   : > { %v596_v30 = vpop.f32.mrb[2].mxu0 }
 0x27a   : > { %v708_v31 = vmul.f32 %v596_v30, %v1965_v8  ;;  %v598_v32 = vpop.f32.mrb[3].mxu0 }
 0x27b   : > { %v709_v33 = vmul.f32 %v598_v32, %v1961_v6  ;;  %v685_v34 = vpop.f32.mrb[2].mxu1 }
 0x27c   : > { %v716_v1 = vadd.f32 %v708_v31, %v685_v34  ;;  %v687_v35 = vpop.f32.mrb[3].mxu1 }
 0x27d   : > { %v717_v36 = vadd.f32 %v709_v33, %v687_v35  ;;  %v602_v37 = vpop.f32.mrb[4].mxu0 }
 0x27e   : > { %v710_v38 = vmul.f32 %v602_v37, %v1974_v12  ;;  %v604_v39 = vpop.f32.mrb[5].mxu0  ;;  %v748_v44 = vmul.f32 %v731_v26, %v716_v1  ;;  %v829_v1 = vpop.permute.xlu0 %828 }
 0x27f   : > { %v711_v42 = vmul.f32 %v604_v39, %v1963_v7  ;;  %v691_v43 = vpop.f32.mrb[4].mxu1  ;;  %v749_v47 = vmul.f32 %v731_v26, %v717_v36  ;;  %v1750_v26 = vld [vmem:[%s2335_s1 + $0x20] sm:$0xff]  }
 0x280   : > { %v718_v45 = vadd.f32 %v710_v38, %v691_v43  ;;  %v693_v46 = vpop.f32.mrb[5].mxu1  ;;  %v780_v54 = vadd.f32 %v763_v51, %v748_v44 }
 0x281   : > { %v719_v8 = vadd.f32 %v711_v42, %v693_v46  ;;  %v608_v48 = vpop.f32.mrb[6].mxu0  ;;  %v781_v58 = vadd.f32 %v763_v51, %v749_v47 }
 0x282   : > { %v750_v49 = vmul.f32 %v736_v27, %v718_v45  ;;  %v712_v6 = vmul.f32 %v608_v48, %v1992_v21  ;;  %v610_v50 = vpop.f32.mrb[7].mxu0 }
 0x283   : > { %v751_v52 = vmul.f32 %v736_v27, %v719_v8  ;;  %v713_v53 = vmul.f32 %v610_v50, %v1980_v15  ;;  %v697_v12 = vpop.f32.mrb[6].mxu1  ;;  %v1751_v27 = vld [vmem:[%s2335_s1 + $0x10] sm:$0xff]  }
 0x284   : > { %v782_v55 = vadd.f32 %v768_v28, %v750_v49  ;;  %v720_v56 = vadd.f32 %v712_v6, %v697_v12  ;;  %v699_v7 = vpop.f32.mrb[7].mxu1 }
 0x285   : > { %v783_v59 = vadd.f32 %v768_v28, %v751_v52  ;;  %v721_v60 = vadd.f32 %v713_v53, %v699_v7  ;;  %v614_v61 = vpop.f32.mrb[8].mxu0  ;;  %v1752_v28 = vld [vmem:[%s2335_s1 + $0x28] sm:$0xff]  }
 0x286   : > { %v788_v62 = vpack.c.bf16 %v782_v55, %v780_v54  ;;  %v714_v63 = vmul.f32 %v614_v61, %v1994_v22  ;;  %v616_v0 = vpop.f32.mrb[9].mxu0  ;;  %v752_v9 = vmul.f32 %v741_v29, %v720_v56  ;;  %v859_v54 = vpop.permute.xlu0 %858 }
 0x287   : > { %v715_v21 = vmul.f32 %v616_v0, %v1982_v16  ;;  %v703_v4 = vpop.f32.mrb[8].mxu1  ;;  %v789_v5 = vpack.c.bf16 %v783_v59, %v781_v58  ;;  %v753_v11 = vmul.f32 %v741_v29, %v721_v60  ;;  %v2139_v29 = vpop.permute.xlu1 %838 }
 0x288   : > { %v722_v15 = vadd.f32 %v714_v63, %v703_v4  ;;  %v705_v10 = vpop.f32.mrb[9].mxu1  ;;  %v784_v19 = vadd.f32 %v773_v57, %v752_v9 }
 0x289   : > { %v723_v13 = vadd.f32 %v715_v21, %v705_v10  ;;  %924 = vmatprep.subr.bf16.mxu0 %v789_v5  ;;  %1605 = vmatprep.subr.bf16.mxu1 %v789_v5  ;;  %v785_v22 = vadd.f32 %v773_v57, %v753_v11 }
 0x28a   : > { %v754_v14 = vmul.f32 %v746_v41, %v722_v15  ;;  %925 = vmatpush1.bf16.msra.mxu0 %v788_v62  ;;  %1607 = vmatpush1.bf16.msra.mxu1 %v788_v62 }
 0x28b   : > { %v755_v18 = vmul.f32 %v746_v41, %v723_v13  ;;  %v2141_v30 = vpop.permute.xlu1 %843 }
 0x28c   : > { %v786_v20 = vadd.f32 %v778_v17, %v754_v14 }
 0x28d   : > { %v787_v23 = vadd.f32 %v778_v17, %v755_v18  ;;  %v869_v18 = vpop.permute.xlu0 %868 }
 0x28e   : > { %v790_v3 = vpack.c.bf16 %v786_v20, %v784_v19 }
 0x28f   : > { %v791_v16 = vpack.c.bf16 %v787_v23, %v785_v22  ;;  %v849_v31 = vpop.permute.xlu1 %848 }
 0x291   : > { %926 = vmatprep.subr.bf16.mxu0 %v791_v16  ;;  %1606 = vmatprep.subr.bf16.mxu1 %v791_v16 }
 0x292   : > { %927 = vmatpush1.bf16.msra.mxu0 %v790_v3  ;;  %1608 = vmatpush1.bf16.msra.mxu1 %v790_v3 }
 0x293   : > { %v854_v32 = vpop.permute.xlu1 %853 }
 0x295   : > { %1491 = vmatmul.mubr.msk.bf16.vlgmr.msra.gmra.mrb[12].mxu0 %vm347_vm3, %v1747_v24  ;;  %1494 = vmatmul.mubr.msk.bf16.vlgmr.msra.gmra.mrb[12].mxu1 %vm347_vm3, %v1748_v2 }
 0x296   : > { %966 = vmatprep.mubr.bf16.mxu0 %v1852_v40  ;;  %996 = vmatprep.mubr.bf16.mxu1 %v1852_v40 }
 0x297   : > { %v819_v33 = vpop.permute.xlu1 %818 }
 0x29d   : > { %1492 = vmatmul.mubr.msk.bf16.gmra.mrb[16].mxu0 %vm347_vm3, %v1749_v25  ;;  %1495 = vmatmul.mubr.msk.bf16.gmra.mrb[16].mxu1 %vm347_vm3, %v1750_v26 }
 0x29e   : > { %976 = vmatprep.mubr.bf16.mxu0 %v1852_v40  ;;  %1006 = vmatprep.mubr.bf16.mxu1 %v1852_v40  ;;  %v824_v40 = vpop.permute.xlu1 %823 }
 0x2a2   : > { %v834_v34 = vpop.permute.xlu1 %833 }
 0x2a5   : > { %1493 = vmatmul.mubr.msk.bf16.gmra.mrb[20].mxu0 %vm347_vm3, %v1751_v27  ;;  %1496 = vmatmul.mubr.msk.bf16.gmra.mrb[20].mxu1 %vm347_vm3, %v1752_v28 }
 0x2a6   : > { %v864_v12 = vpop.permute.xlu1 %863 }
 0x2aa   : > { %v874_v17 = vpop.permute.xlu1 %873 }
 0x368   : > { %v958_v35 = vpop.f32.mrb[12].mxu0  ;;  %v988_v36 = vpop.f32.mrb[12].mxu1 }
 0x369   : > { %v959_v37 = vadd.f32 %v958_v35, %v819_v33  ;;  %v2147_v38 = vadd.f32 %v988_v36, %v849_v31  ;;  %v960_v39 = vpop.f32.mrb[13].mxu0  ;;  %v990_v41 = vpop.f32.mrb[13].mxu1 }
 0x36a   : > { %v961_v42 = vadd.f32 %v960_v39, %v819_v33  ;;  %v2149_v43 = vadd.f32 %v990_v41, %v849_v31  ;;  %v962_v44 = vpop.f32.mrb[14].mxu0  ;;  %v992_v45 = vpop.f32.mrb[14].mxu1 }
 0x36b   : > { %v963_v46 = vadd.f32 %v962_v44, %v824_v40  ;;  %v2151_v47 = vadd.f32 %v992_v45, %v854_v32  ;;  %v964_v8 = vpop.f32.mrb[15].mxu0  ;;  %v994_v48 = vpop.f32.mrb[15].mxu1 }
 0x36c   : > { %v1547_v49 = vpack.c.bf16 %v961_v42, %v959_v37  ;;  %v1663_v6 = vpack.i.bf16 %v2149_v43, %v2147_v38  ;;  %v965_v50 = vadd.f32 %v964_v8, %v824_v40  ;;  %v995_v51 = vadd.f32 %v994_v48, %v854_v32 }
 0x36e   : > { %1041 = vst [vmem:[%s2157_s20] sm:$0xff] %v1547_v49  ;;  %v1548_v52 = vpack.c.bf16 %v965_v50, %v963_v46  ;;  %v1665_v53 = vpack.i.bf16 %v995_v51, %v2151_v47 }
 0x370   : > { %1042 = vst [vmem:[%s2157_s20 + $0x8] sm:$0xff] %v1548_v52  ;;  %v968_v55 = vpop.f32.mrb[16].mxu0  ;;  %v998_v56 = vpop.f32.mrb[16].mxu1 }
 0x371   : > { %v969_v7 = vadd.f32 %v968_v55, %v829_v1  ;;  %v999_v57 = vadd.f32 %v998_v56, %v859_v54  ;;  %v970_v58 = vpop.f32.mrb[17].mxu0  ;;  %v1000_v59 = vpop.f32.mrb[17].mxu1 }
 0x372   : > { %v971_v60 = vadd.f32 %v970_v58, %v829_v1  ;;  %v1001_v61 = vadd.f32 %v1000_v59, %v859_v54  ;;  %v972_v62 = vpop.f32.mrb[18].mxu0  ;;  %v1002_v63 = vpop.f32.mrb[18].mxu1 }
 0x373   : > { %v973_v0 = vadd.f32 %v972_v62, %v834_v34  ;;  %v1003_v21 = vadd.f32 %v1002_v63, %v864_v12  ;;  %v974_v4 = vpop.f32.mrb[19].mxu0  ;;  %v1004_v5 = vpop.f32.mrb[19].mxu1 }
 0x374   : > { %v1549_v9 = vpack.c.bf16 %v971_v60, %v969_v7  ;;  %v1583_v15 = vpack.c.bf16 %v1001_v61, %v999_v57  ;;  %v975_v10 = vadd.f32 %v974_v4, %v834_v34  ;;  %v1005_v11 = vadd.f32 %v1004_v5, %v864_v12 }
 0x376   : > { %1043 = vst [vmem:[%s2157_s20 + $0x10] sm:$0xff] %v1549_v9  ;;  %1294 = vst [vmem:[%s2165_s21] sm:$0xff] %v1583_v15  ;;  %v1550_v13 = vpack.c.bf16 %v975_v10, %v973_v0  ;;  %v1584_v14 = vpack.c.bf16 %v1005_v11, %v1003_v21 }
 0x378   : > { %1044 = vst [vmem:[%s2157_s20 + $0x18] sm:$0xff] %v1550_v13  ;;  %1295 = vst [vmem:[%s2165_s21 + $0x8] sm:$0xff] %v1584_v14  ;;  %v978_v19 = vpop.f32.mrb[20].mxu0  ;;  %v1008_v20 = vpop.f32.mrb[20].mxu1  ;;  %s1755_s20 = scalar_lea.vmem %s2178_s22, 512 }
 0x379   : > { %v979_v22 = vadd.f32 %v978_v19, %v2139_v29  ;;  %v1009_v23 = vadd.f32 %v1008_v20, %v869_v18  ;;  %v980_v3 = vpop.f32.mrb[21].mxu0  ;;  %v1010_v16 = vpop.f32.mrb[21].mxu1  ;;  %p1756_p11 = scmp.ne.s32.totalorder %s2178_s22, %s1755_s20 }
 0x37a   : > { %v981_v24 = vadd.f32 %v980_v3, %v2139_v29  ;;  %v1011_v2 = vadd.f32 %v1010_v16, %v869_v18  ;;  %v982_v25 = vpop.f32.mrb[22].mxu0  ;;  %v1012_v26 = vpop.f32.mrb[22].mxu1 }
 0x37b   : > { %v983_v27 = vadd.f32 %v982_v25, %v2141_v30  ;;  %v1013_v28 = vadd.f32 %v1012_v26, %v874_v17  ;;  %v984_v31 = vpop.f32.mrb[23].mxu0  ;;  %v1014_v32 = vpop.f32.mrb[23].mxu1  ;;  %p1757_p12 = pnand %p1756_p11, %p1935_p5 }
 0x37c   : > { %v1659_v33 = vpack.i.bf16 %v981_v24, %v979_v22  ;;  %v1585_v40 = vpack.c.bf16 %v1011_v2, %v1009_v23  ;;  %v985_v34 = vadd.f32 %v984_v31, %v2141_v30  ;;  %v1015_v1 = vadd.f32 %v1014_v32, %v874_v17 }
 0x37d   : > { %p1758_p13 = pneg %p1757_p12 }
 0x37e   : > { %1296 = vst [vmem:[%s2165_s21 + $0x10] sm:$0xff] %v1585_v40  ;;  %v1661_v29 = vpack.i.bf16 %v985_v34, %v983_v27  ;;  %v1586_v35 = vpack.c.bf16 %v1015_v1, %v1013_v28  ;;  %1660 = vxpose.xlu0.b32.start [1/4] (short) %v1659_v33, 128 }
 0x380   : > { %1297 = vst [vmem:[%s2165_s21 + $0x18] sm:$0xff] %v1586_v35  ;;  %s1853_s21 = smov [#allocation2]  }
 0x381   : > { %s1759_s0 = sshll.u32 %s1853_s21, 4  ;;  %s1760_s0 = int_to_ptr.vmem [resolvable:$false] %s1759_s0 }
 0x382   : > { %1662 = vxpose.xlu0.b32.cont [2/4] (short) %v1661_v29, 128  ;;  %s1761_s28 = scalar_lea.vmem %s1760_s0, 1024  ;;  %p1762_p0 = scmp.lt.s32.totalorder %s2178_s22, %s1760_s0 }
 0x383   : > { %p1763_p1 = scmp.lt.s32.totalorder %s1761_s28, %s1755_s20 }
 0x385   : > { %p1764_p2 = por %p1763_p1, %p1762_p0 }
 0x386   : > { %1664 = vxpose.xlu0.b32.cont [3/4] (short) %v1663_v6, 128 }
 0x387   : > { %p1765_p3 = pnand %p1764_p2, %p1758_p13 }
 0x38a   : > { %1666 = vxpose.xlu0.b32.end [4/4] (short) %v1665_v53, 128 }
 0x38b   : > { %1768 = shalt.err (!%p1765_p3)
}
 0x38c   : > { %s1769_s29 = scalar_lea.hbm %s2186_s14, 512  ;;  %s1773_s15 = scalar_lea.hbm %s2339_s5, 1024 }
 0x38d   : > { %p1770_p4 = scmp.ne.s32.totalorder %s2186_s14, %s1769_s29  ;;  %p1774_p9 = scmp.lt.u32.totalorder %s2186_s14, %s2339_s5 }
 0x38e   : > { %p1775_p10 = scmp.lt.u32.totalorder %s1773_s15, %s1769_s29  ;;  %p1777_p12 = scmp.lt.u32.totalorder %s1769_s29, %s2186_s14 }
 0x38f   : > { %p1771_p7 = pnand %p1770_p4, %p1935_p5 }
 0x390   : > { %p1776_p11 = por %p1775_p10, %p1774_p9 }
 0x391   : > { %p1772_p8 = pneg %p1771_p7 }
 0x392   : > { %p1778_p13 = por %p1777_p12, %p1776_p11 }
 0x394   : > { %p1779_p0 = pnand %p1778_p13, %p1772_p8 }
 0x396   : > { %1782 = shalt.err (!%p1779_p0)
}
 0x397   : > { %s1854_s20 = smov 128   ;;  %s1855_s21 = smov 8  }
 0x398   : > { %1609 = dma.vmem_to_hbm [thread:$0]  (%p1935_p5), %s2178_s22, 512, %s2186_s14, %s1299_s19, %s1854_s20, %s1854_s20, %s1855_s21  }
 0x399   : > { %s1309_s28 = scalar_lea.sflag [#allocation5], %s2144_s18  ;;  %s1783_s29 = scalar_lea.vmem %s2180_s23, 512 }
 0x39a   : > { %p1784_p1 = scmp.ne.s32.totalorder %s2180_s23, %s1783_s29  ;;  %s1856_s8 = smov [#allocation4]  }
 0x39b   : > { %s1787_s9 = sshll.u32 %s1856_s8, 4  ;;  %s1788_s9 = int_to_ptr.vmem [resolvable:$false] %s1787_s9 }
 0x39c   : > { %p1785_p2 = pnand %p1784_p1, %p1935_p5  ;;  %s1789_s15 = scalar_lea.vmem %s1788_s9, 1024 }
 0x39d   : > { %p1790_p4 = scmp.lt.s32.totalorder %s2180_s23, %s1788_s9  ;;  %p1791_p7 = scmp.lt.s32.totalorder %s1789_s15, %s1783_s29 }
 0x39e   : > { %p1786_p3 = pneg %p1785_p2 }
 0x39f   : > { %p1792_p8 = por %p1791_p7, %p1790_p4 }
 0x3a1   : > { %p1793_p9 = pnand %p1792_p8, %p1786_p3 }
 0x3a3   : > { %1796 = shalt.err (!%p1793_p9)
}
 0x3a4   : > { %s1797_s22 = scalar_lea.hbm %s2191_s17, 512  ;;  %s1801_s16 = scalar_lea.hbm %s2341_s7, 1024 }
 0x3a5   : > { %p1798_p10 = scmp.ne.s32.totalorder %s2191_s17, %s1797_s22  ;;  %p1802_p13 = scmp.lt.u32.totalorder %s2191_s17, %s2341_s7 }
 0x3a6   : > { %p1803_p0 = scmp.lt.u32.totalorder %s1801_s16, %s1797_s22  ;;  %p1805_p2 = scmp.lt.u32.totalorder %s1797_s22, %s2191_s17 }
 0x3a7   : > { %p1799_p11 = pnand %p1798_p10, %p1935_p5 }
 0x3a8   : > { %p1804_p1 = por %p1803_p0, %p1802_p13 }
 0x3a9   : > { %p1800_p12 = pneg %p1799_p11 }
 0x3aa   : > { %p1806_p3 = por %p1805_p2, %p1804_p1 }
 0x3ac   : > { %p1807_p4 = pnand %p1806_p3, %p1800_p12 }
 0x3ae   : > { %1810 = shalt.err (!%p1807_p4)
}
 0x3af   : > { %1610 = dma.vmem_to_hbm [thread:$0]  (%p1935_p5), %s2180_s23, 512, %s2191_s17, %s1309_s28, %s1854_s20, %s1854_s20, %s1855_s21   ;;  %vm1237_vm1 = vcmask 257024  }
 0x3b0   : > { %s1546_s29 = sshll.u32 %s1949_s13, 7 }
 0x3b1   : > { %s2251_s22 = scalar_lea.vmem %s2340_s6, %s1546_s29 }
 0x3fe   : > { %v1667_v30 = vpop.trf.xlu0 }
 0x3ff   : > { %v1671_v36 = vunpack.i.h.bf16 %v1667_v30  ;;  %v1668_v37 = vunpack.i.l.bf16 %v1667_v30 }
 0x401   : > { %v1567_v38 = vpack.c.bf16 %v1671_v36, %v1671_v36  ;;  %v1551_v39 = vpack.c.bf16 %v1668_v37, %v1668_v37 }
 0x402   : > { %v1672_v41 = vpop.trf.xlu0 }
 0x403   : > { %1254 = vst.msk [vmem:[%s2251_s22 + $0x40] sm:$0xf] %vm1237_vm1, %v1567_v38  ;;  %1238 = vst.msk [vmem:[%s2251_s22] sm:$0xf] %vm1237_vm1, %v1551_v39  ;;  %v1676_v42 = vunpack.i.h.bf16 %v1672_v41  ;;  %v1673_v43 = vunpack.i.l.bf16 %v1672_v41 }
 0x405   : > { %v1568_v44 = vpack.c.bf16 %v1676_v42, %v1676_v42  ;;  %v1552_v45 = vpack.c.bf16 %v1673_v43, %v1673_v43 }
 0x406   : > { %v1677_v46 = vpop.trf.xlu0 }
 0x407   : > { %1255 = vst.msk [vmem:[%s2251_s22 + $0x44] sm:$0xf] %vm1237_vm1, %v1568_v44  ;;  %1239 = vst.msk [vmem:[%s2251_s22 + $0x4] sm:$0xf] %vm1237_vm1, %v1552_v45  ;;  %v1681_v47 = vunpack.i.h.bf16 %v1677_v46  ;;  %v1678_v8 = vunpack.i.l.bf16 %v1677_v46 }
 0x409   : > { %v1569_v48 = vpack.c.bf16 %v1681_v47, %v1681_v47  ;;  %v1553_v49 = vpack.c.bf16 %v1678_v8, %v1678_v8 }
 0x40a   : > { %v1682_v6 = vpop.trf.xlu0 }
 0x40b   : > { %1256 = vst.msk [vmem:[%s2251_s22 + $0x48] sm:$0xf] %vm1237_vm1, %v1569_v48  ;;  %1240 = vst.msk [vmem:[%s2251_s22 + $0x8] sm:$0xf] %vm1237_vm1, %v1553_v49  ;;  %v1686_v50 = vunpack.i.h.bf16 %v1682_v6  ;;  %v1683_v51 = vunpack.i.l.bf16 %v1682_v6 }
 0x40d   : > { %v1570_v52 = vpack.c.bf16 %v1686_v50, %v1686_v50  ;;  %v1554_v53 = vpack.c.bf16 %v1683_v51, %v1683_v51 }
 0x40e   : > { %v1687_v12 = vpop.trf.xlu0 }
 0x40f   : > { %1257 = vst.msk [vmem:[%s2251_s22 + $0x4c] sm:$0xf] %vm1237_vm1, %v1570_v52  ;;  %1241 = vst.msk [vmem:[%s2251_s22 + $0xc] sm:$0xf] %vm1237_vm1, %v1554_v53  ;;  %v1691_v54 = vunpack.i.h.bf16 %v1687_v12  ;;  %v1688_v55 = vunpack.i.l.bf16 %v1687_v12 }
 0x411   : > { %v1571_v56 = vpack.c.bf16 %v1691_v54, %v1691_v54  ;;  %v1555_v7 = vpack.c.bf16 %v1688_v55, %v1688_v55 }
 0x412   : > { %v1692_v57 = vpop.trf.xlu0 }
 0x413   : > { %1258 = vst.msk [vmem:[%s2251_s22 + $0x50] sm:$0xf] %vm1237_vm1, %v1571_v56  ;;  %1242 = vst.msk [vmem:[%s2251_s22 + $0x10] sm:$0xf] %vm1237_vm1, %v1555_v7  ;;  %v1696_v58 = vunpack.i.h.bf16 %v1692_v57  ;;  %v1693_v59 = vunpack.i.l.bf16 %v1692_v57 }
 0x415   : > { %v1572_v60 = vpack.c.bf16 %v1696_v58, %v1696_v58  ;;  %v1556_v61 = vpack.c.bf16 %v1693_v59, %v1693_v59 }
 0x416   : > { %v1697_v62 = vpop.trf.xlu0 }
 0x417   : > { %1259 = vst.msk [vmem:[%s2251_s22 + $0x54] sm:$0xf] %vm1237_vm1, %v1572_v60  ;;  %1243 = vst.msk [vmem:[%s2251_s22 + $0x14] sm:$0xf] %vm1237_vm1, %v1556_v61  ;;  %v1701_v63 = vunpack.i.h.bf16 %v1697_v62  ;;  %v1698_v0 = vunpack.i.l.bf16 %v1697_v62 }
 0x419   : > { %v1573_v21 = vpack.c.bf16 %v1701_v63, %v1701_v63  ;;  %v1557_v4 = vpack.c.bf16 %v1698_v0, %v1698_v0 }
 0x41a   : > { %v1702_v5 = vpop.trf.xlu0 }
 0x41b   : > { %1260 = vst.msk [vmem:[%s2251_s22 + $0x58] sm:$0xf] %vm1237_vm1, %v1573_v21  ;;  %1244 = vst.msk [vmem:[%s2251_s22 + $0x18] sm:$0xf] %vm1237_vm1, %v1557_v4  ;;  %v1706_v9 = vunpack.i.h.bf16 %v1702_v5  ;;  %v1703_v15 = vunpack.i.l.bf16 %v1702_v5 }
 0x41d   : > { %v1574_v10 = vpack.c.bf16 %v1706_v9, %v1706_v9  ;;  %v1558_v11 = vpack.c.bf16 %v1703_v15, %v1703_v15 }
 0x41e   : > { %v1707_v13 = vpop.trf.xlu0 }
 0x41f   : > { %1261 = vst.msk [vmem:[%s2251_s22 + $0x5c] sm:$0xf] %vm1237_vm1, %v1574_v10  ;;  %1245 = vst.msk [vmem:[%s2251_s22 + $0x1c] sm:$0xf] %vm1237_vm1, %v1558_v11  ;;  %v1711_v14 = vunpack.i.h.bf16 %v1707_v13  ;;  %v1708_v17 = vunpack.i.l.bf16 %v1707_v13 }
 0x421   : > { %v1575_v18 = vpack.c.bf16 %v1711_v14, %v1711_v14  ;;  %v1559_v19 = vpack.c.bf16 %v1708_v17, %v1708_v17 }
 0x422   : > { %v1712_v20 = vpop.trf.xlu0 }
 0x423   : > { %1262 = vst.msk [vmem:[%s2251_s22 + $0x60] sm:$0xf] %vm1237_vm1, %v1575_v18  ;;  %1246 = vst.msk [vmem:[%s2251_s22 + $0x20] sm:$0xf] %vm1237_vm1, %v1559_v19  ;;  %v1716_v22 = vunpack.i.h.bf16 %v1712_v20  ;;  %v1713_v23 = vunpack.i.l.bf16 %v1712_v20 }
 0x425   : > { %v1576_v3 = vpack.c.bf16 %v1716_v22, %v1716_v22  ;;  %v1560_v16 = vpack.c.bf16 %v1713_v23, %v1713_v23 }
 0x426   : > { %v1717_v24 = vpop.trf.xlu0 }
 0x427   : > { %1263 = vst.msk [vmem:[%s2251_s22 + $0x64] sm:$0xf] %vm1237_vm1, %v1576_v3  ;;  %1247 = vst.msk [vmem:[%s2251_s22 + $0x24] sm:$0xf] %vm1237_vm1, %v1560_v16  ;;  %v1721_v2 = vunpack.i.h.bf16 %v1717_v24  ;;  %v1718_v25 = vunpack.i.l.bf16 %v1717_v24 }
 0x429   : > { %v1577_v26 = vpack.c.bf16 %v1721_v2, %v1721_v2  ;;  %v1561_v27 = vpack.c.bf16 %v1718_v25, %v1718_v25 }
 0x42a   : > { %v1722_v28 = vpop.trf.xlu0 }
 0x42b   : > { %1264 = vst.msk [vmem:[%s2251_s22 + $0x68] sm:$0xf] %vm1237_vm1, %v1577_v26  ;;  %1248 = vst.msk [vmem:[%s2251_s22 + $0x28] sm:$0xf] %vm1237_vm1, %v1561_v27  ;;  %v1726_v31 = vunpack.i.h.bf16 %v1722_v28  ;;  %v1723_v32 = vunpack.i.l.bf16 %v1722_v28 }
 0x42d   : > { %v1578_v33 = vpack.c.bf16 %v1726_v31, %v1726_v31  ;;  %v1562_v40 = vpack.c.bf16 %v1723_v32, %v1723_v32 }
 0x42e   : > { %v1727_v34 = vpop.trf.xlu0 }
 0x42f   : > { %1265 = vst.msk [vmem:[%s2251_s22 + $0x6c] sm:$0xf] %vm1237_vm1, %v1578_v33  ;;  %1249 = vst.msk [vmem:[%s2251_s22 + $0x2c] sm:$0xf] %vm1237_vm1, %v1562_v40  ;;  %v1731_v1 = vunpack.i.h.bf16 %v1727_v34  ;;  %v1728_v29 = vunpack.i.l.bf16 %v1727_v34 }
 0x431   : > { %v1579_v35 = vpack.c.bf16 %v1731_v1, %v1731_v1  ;;  %v1563_v30 = vpack.c.bf16 %v1728_v29, %v1728_v29 }
 0x432   : > { %v1732_v36 = vpop.trf.xlu0 }
 0x433   : > { %1266 = vst.msk [vmem:[%s2251_s22 + $0x70] sm:$0xf] %vm1237_vm1, %v1579_v35  ;;  %1250 = vst.msk [vmem:[%s2251_s22 + $0x30] sm:$0xf] %vm1237_vm1, %v1563_v30  ;;  %v1736_v37 = vunpack.i.h.bf16 %v1732_v36  ;;  %v1733_v38 = vunpack.i.l.bf16 %v1732_v36 }
 0x435   : > { %v1580_v39 = vpack.c.bf16 %v1736_v37, %v1736_v37  ;;  %v1564_v41 = vpack.c.bf16 %v1733_v38, %v1733_v38 }
 0x436   : > { %v1737_v42 = vpop.trf.xlu0 }
 0x437   : > { %1267 = vst.msk [vmem:[%s2251_s22 + $0x74] sm:$0xf] %vm1237_vm1, %v1580_v39  ;;  %1251 = vst.msk [vmem:[%s2251_s22 + $0x34] sm:$0xf] %vm1237_vm1, %v1564_v41  ;;  %v1741_v43 = vunpack.i.h.bf16 %v1737_v42  ;;  %v1738_v44 = vunpack.i.l.bf16 %v1737_v42 }
 0x439   : > { %v1581_v45 = vpack.c.bf16 %v1741_v43, %v1741_v43  ;;  %v1565_v46 = vpack.c.bf16 %v1738_v44, %v1738_v44 }
 0x43a   : > { %v1742_v47 = vpop.trf.xlu0 }
 0x43b   : > { %1268 = vst.msk [vmem:[%s2251_s22 + $0x78] sm:$0xf] %vm1237_vm1, %v1581_v45  ;;  %1252 = vst.msk [vmem:[%s2251_s22 + $0x38] sm:$0xf] %vm1237_vm1, %v1565_v46  ;;  %v1746_v8 = vunpack.i.h.bf16 %v1742_v47  ;;  %v1743_v48 = vunpack.i.l.bf16 %v1742_v47 }
 0x43d   : > { %v1582_v49 = vpack.c.bf16 %v1746_v8, %v1746_v8  ;;  %v1566_v6 = vpack.c.bf16 %v1743_v48, %v1743_v48 }
 0x43f   : > { %1269 = vst.msk [vmem:[%s2251_s22 + $0x7c] sm:$0xf] %vm1237_vm1, %v1582_v49  ;;  %1253 = vst.msk [vmem:[%s2251_s22 + $0x3c] sm:$0xf] %vm1237_vm1, %v1566_v6 }
 0x440 PF: > { %p1620_p5 = scmp.ge.s32.totalorder %s1849_s27, 2  ;;  %s1356_s11 = sand.u32 1, %s1837_s24  }
 0x441   : > { %s1357_s13 = scalar_lea.sflag [#allocation3], %s1356_s11 }
 0x442   : > { %p1614_p7 = pnand %p1620_p5, %p1939_p6 }
 0x444   : > { %1828 = dma.done.wait (!%p1614_p7), %s1357_s13, 512  }
 0x445   : > { %1830 = vsyncadd (!%p1614_p7), %s1357_s13, 4294966784  ;;  %s1374_s18 = scalar_lea.sflag [#allocation5], %s1356_s11 }
 0x446   : > { %1832 = dma.done.wait (!%p1614_p7), %s1374_s18, 512  }
 0x447   : > { %1834 = vsyncadd (!%p1614_p7), %s1374_s18, 4294966784  ;;  %p21_p8 = scmp.ge.s32.totalorder %s1922_s30, 4   ;;  %s2348_s24 = smov %s1841_s25 }
 0x448   : > { %s2349_s25 = smov %s1845_s26  ;;  %s2350_s26 = smov %s1933_s10 }
 0x449   : > { %s2351_s27 = smov %s1922_s30  ;;  %23 = sbr.rel (!%p21_p8) target bundleno = 7 (0x7), region = 104 }
 0x450   :  { %1379 = vsyncpa [#allocation3], 1 }
 0x451   :  { %1381 = vsyncpa [#allocation3 + $0x1], 1 }
 0x452   :  { %1382 = vsyncpa [#allocation5], 1 }
 0x453   :  { %1384 = vsyncpa [#allocation5 + $0x1], 1 }

</bundles_post_ra>
